<compile_context>
chip_gen: v5e
topology: v5e:2x2
jax: 0.10.0
libtpu: 0.0.40
codegen_flags: <defaults>
</compile_context>

<pallas_src>
import math

import jax
import jax.numpy as jnp
from jax.experimental import pallas as pl
from jax.experimental.pallas import tpu as pltpu


# ----------------------------------------------------------------------------
# Parameter setup (plain JAX; matches the PyTorch buffer exactly for even D).
# ----------------------------------------------------------------------------
def _get_timing_signal(length: int, channels: int) -> jnp.ndarray:
    position = jnp.arange(length, dtype=jnp.float32)[:, None]            # (L, 1)
    div_term = jnp.exp(
        jnp.arange(0, channels, 2, dtype=jnp.float32)
        * -(math.log(10000.0) / channels)
    )                                                                    # (ceil(C/2),)
    angles = position * div_term                                         # (L, ceil(C/2))
    pe = jnp.zeros((length, channels), dtype=jnp.float32)
    pe = pe.at[:, 0::2].set(jnp.sin(angles))
    # Guard odd channel counts; identical to torch for even C (the canonical case).
    pe = pe.at[:, 1::2].set(jnp.cos(angles[:, : channels // 2]))
    return pe[None, :, :]                                                # (1, L, C)


# ----------------------------------------------------------------------------
# Kernel: tile-wise broadcast add.  pe block has a size-1 leading dim and
# broadcasts over the folded batch rows; the add happens in the promoted dtype
# (f32 table + x), the store downcasts to the output dtype.
# ----------------------------------------------------------------------------
def _add_pe_kernel(x_ref, pe_ref, o_ref):
    o_ref[...] = (x_ref[...] + pe_ref[...]).astype(o_ref.dtype)


def _round_up(n: int, m: int) -> int:
    return ((n + m - 1) // m) * m


def _round_down(n: int, m: int) -> int:
    return (n // m) * m


def _packing(dtype) -> int:
    # Sublane packing: f32 -> 8 rows/vreg, bf16/f16 -> 16, int8/fp8 -> 32.
    return 8 * max(1, 4 // jnp.dtype(dtype).itemsize)


# Total VMEM devoted to resident blocks (x, out, pe, each counted as
# double-buffered and pe conservatively as large as an x tile).  This lands
# ~4-6 MiB per slab: on v7x (~3.2 TB/s) the fixed ~0.35 us/step overhead drops
# to <10% of a step, and on v5e/v6e it is well onto the roofline plateau.
_VMEM_BLOCK_BUDGET = 24 * 1024 * 1024
_VMEM_LIMIT_BYTES = 40 * 1024 * 1024   # < v7x 64 MiB physical; << v5e/v6e 128 MiB
# Below this total size a single-step grid is fine (nothing worth sharding).
_MEGACORE_MIN_BYTES = 1 * 1024 * 1024


# ----------------------------------------------------------------------------
# Core 3-D path: x3 (B, S, D) with D a multiple of 128, pe3 (1, L, D), L >= S.
# ----------------------------------------------------------------------------
def _add_pe_3d(x3: jnp.ndarray, pe3: jnp.ndarray, out_dtype) -> jnp.ndarray:
    B, S, D = x3.shape
    isz_x = jnp.dtype(x3.dtype).itemsize
    isz_pe = jnp.dtype(pe3.dtype).itemsize
    isz_o = jnp.dtype(out_dtype).itemsize
    sub = max(_packing(x3.dtype), _packing(pe3.dtype), _packing(out_dtype))

    # Conservative resident-VMEM bytes per x-tile element (x/out/pe double-buffered).
    per_elem = 2 * (isz_x + isz_o + isz_pe)
    tile_elems = max(8 * D, _VMEM_BLOCK_BUDGET // per_elem)
    rows_budget = max(8, tile_elems // D)

    if S < 8:
        # Too few rows to form an (8, .)-aligned block: make every block shape
        # equal the full array dims (always legal).  Slice the table so its row
        # count matches S exactly (tiny copy: S*D elements, rare path).
        pe3 = pe3[:, :S, :]
        ts = S
    else:
        cap = min(S, rows_budget)
        ts = _round_down(cap, sub)
        if ts == 0:                       # e.g. S == 8 with bf16 packing (sub=16)
            ts = _round_down(cap, 8)

    # Batch folding: without it, tiny-S shapes degenerate into B grid steps of a
    # few KiB each, where the ~0.35 us/step overhead dominates.
    bb = max(1, min(B, tile_elems // (ts * D)))

    # Megacore (v7x has 2 TCs): if a big shape collapsed into a single block,
    # re-split the sequence axis so "parallel" can shard across cores.
    total_bytes = B * S * D * isz_x
    if (pl.cdiv(S, ts) * pl.cdiv(B, bb) == 1
            and S >= 2 * sub
            and total_bytes >= _MEGACORE_MIN_BYTES):
        n_target = int(min(8, max(2, total_bytes // (4 * 1024 * 1024))))
        ts = max(sub, _round_up(pl.cdiv(S, n_target), sub))
        bb = max(1, min(B, tile_elems // (ts * D)))

    n_s = pl.cdiv(S, ts)
    n_b = pl.cdiv(B, bb)

    return pl.pallas_call(
        _add_pe_kernel,
        out_shape=jax.ShapeDtypeStruct((B, S, D), out_dtype),
        # Batch axis innermost -> the pe block index (0, s, 0) is constant across
        # the inner loop, so each table tile is fetched once per sequence tile.
        grid=(n_s, n_b),
        in_specs=[
            pl.BlockSpec((bb, ts, D), lambda s, b: (b, s, 0)),   # x
            pl.BlockSpec((1, ts, D), lambda s, b: (0, s, 0)),    # pe (native dtype, no cast)
        ],
        out_specs=pl.BlockSpec((bb, ts, D), lambda s, b: (b, s, 0)),
        compiler_params=pltpu.CompilerParams(
            dimension_semantics=("parallel", "parallel"),
            vmem_limit_bytes=_VMEM_LIMIT_BYTES,
        ),
    )(x3, pe3)


# ----------------------------------------------------------------------------
# Last-resort path: neither D nor S*D is a multiple of 128.  Full-row blocks
# (last dims equal to the full array dims are always legal); tile over batch.
# ----------------------------------------------------------------------------
def _add_pe_2d_fallback(x: jnp.ndarray, encoding: jnp.ndarray, out_dtype) -> jnp.ndarray:
    B, S, D = x.shape
    F = S * D
    isz_x = jnp.dtype(x.dtype).itemsize
    isz_pe = jnp.dtype(encoding.dtype).itemsize
    isz_o = jnp.dtype(out_dtype).itemsize
    sub = max(_packing(x.dtype), _packing(encoding.dtype), _packing(out_dtype))

    x2 = x.reshape(B, F)
    # F is not lane-aligned, so a partial-column block of the big table would be
    # illegal; slice the table to exactly (1, F) instead (tiny, rare path).
    pe2 = encoding[:, :S, :].reshape(1, F)

    rows_budget = max(1, _VMEM_BLOCK_BUDGET // (F * 2 * (isz_x + isz_o + isz_pe)))
    if rows_budget >= B:
        tb = B
    else:
        tb = min(B, max(sub, _round_down(rows_budget, sub)))
    n_b = pl.cdiv(B, tb)

    out2 = pl.pallas_call(
        _add_pe_kernel,
        out_shape=jax.ShapeDtypeStruct((B, F), out_dtype),
        grid=(n_b,),
        in_specs=[
            pl.BlockSpec((tb, F), lambda b: (b, 0)),   # x rows
            pl.BlockSpec((1, F), lambda b: (0, 0)),    # pe row, revisited every step
        ],
        out_specs=pl.BlockSpec((tb, F), lambda b: (b, 0)),
        compiler_params=pltpu.CompilerParams(
            dimension_semantics=("parallel",),
            vmem_limit_bytes=_VMEM_LIMIT_BYTES,
        ),
    )(x2, pe2)
    return out2.reshape(B, S, D)


# ----------------------------------------------------------------------------
# Public wrapper.
# ----------------------------------------------------------------------------
def positional_encoding_forward(x: jnp.ndarray, encoding: jnp.ndarray) -> jnp.ndarray:
    """x: (B, S, D); encoding: (1, max_len, D).  Returns x + encoding[:, :S]."""
    B, S, D = x.shape
    one, max_len, d_enc = encoding.shape
    assert one == 1 and d_enc == D and max_len >= S, "encoding table incompatible with x"

    # No wrapper-side cast of the (possibly huge) max_len table: the kernel adds
    # in the promoted dtype and downcasts only on store.  This also reproduces
    # PyTorch's `x + fp32_buffer` type-promotion semantics.
    out_dtype = jnp.result_type(x.dtype, encoding.dtype)

    if D % 128 == 0:
        # Already lane-dense: tile the sequence axis, fold batch into the block.
        return _add_pe_3d(x, encoding, out_dtype)

    F = S * D
    if F % 128 == 0:
        # Flatten (S, D) into lane-dense rows of 128: full (8,128) vreg occupancy
        # for any batch size, contiguous per-block DMAs, and the in-kernel
        # broadcast stays on the cheap leading block dim.
        S_eff = F // 128
        x3 = x.reshape(B, S_eff, 128)
        if (max_len * D) % 128 == 0:
            pe3 = encoding.reshape(1, (max_len * D) // 128, 128)   # no slice, no copy
        else:
            pe3 = encoding[:, :S, :].reshape(1, S_eff, 128)        # rare: tiny slice
        out = _add_pe_3d(x3, pe3, out_dtype)
        return out.reshape(B, S, D)

    return _add_pe_2d_fallback(x, encoding, out_dtype)


if __name__ == "__main__":
    key = jax.random.PRNGKey(0)

    # Case 1: small d_model (D=32) -> flattened lane-dense 3-D path, no table slice.
    B, S, D, MAX_LEN = 2, 8, 32, 64
    x = jax.random.normal(key, (B, S, D), dtype=jnp.float32)
    enc = _get_timing_signal(MAX_LEN, D)
    out = jax.block_until_ready(positional_encoding_forward(x, enc))
    ref = x + enc[:, :S, :]
    assert out.shape == (B, S, D) and out.dtype == ref.dtype
    assert jnp.allclose(out, ref, atol=1e-6), "mismatch (flattened 3-D path)"

    # Case 2: d_model a multiple of 128 -> native 3-D path with batch folding.
    B2, S2, D2, MAX_LEN2 = 2, 8, 128, 16
    x2 = jax.random.normal(jax.random.fold_in(key, 1), (B2, S2, D2), dtype=jnp.float32)
    enc2 = _get_timing_signal(MAX_LEN2, D2)
    out2 = jax.block_until_ready(positional_encoding_forward(x2, enc2))
    ref2 = x2 + enc2[:, :S2, :]
    assert jnp.allclose(out2, ref2, atol=1e-6), "mismatch (native 3-D path)"

    # Case 3: max_len*D not lane-aligned (max_len close to S) -> sliced-table branch.
    B3, S3, D3, MAX_LEN3 = 2, 8, 32, 13
    x3 = jax.random.normal(jax.random.fold_in(key, 2), (B3, S3, D3), dtype=jnp.float32)
    enc3 = _get_timing_signal(MAX_LEN3, D3)
    out3 = jax.block_until_ready(positional_encoding_forward(x3, enc3))
    ref3 = x3 + enc3[:, :S3, :]
    assert jnp.allclose(out3, ref3, atol=1e-6), "mismatch (sliced-table branch)"

    # Case 4: neither D nor S*D lane-aligned -> 2-D fallback path.
    B4, S4, D4, MAX_LEN4 = 4, 5, 24, 10
    x4 = jax.random.normal(jax.random.fold_in(key, 3), (B4, S4, D4), dtype=jnp.float32)
    enc4 = _get_timing_signal(MAX_LEN4, D4)
    out4 = jax.block_until_ready(positional_encoding_forward(x4, enc4))
    ref4 = x4 + enc4[:, :S4, :]
    assert jnp.allclose(out4, ref4, atol=1e-6), "mismatch (2-D fallback path)"

    # Case 5: bf16 activations + f32 table -> add in f32 (PyTorch promotion semantics).
    x5 = jax.random.normal(jax.random.fold_in(key, 4), (B2, S2, D2)).astype(jnp.bfloat16)
    out5 = jax.block_until_ready(positional_encoding_forward(x5, enc2))
    ref5 = x5 + enc2[:, :S2, :]
    assert out5.dtype == ref5.dtype == jnp.float32
    assert jnp.allclose(out5, ref5, atol=1e-6), "mismatch (bf16 promotion)"

    print("KERNEL_OK")
</pallas_src>

<mosaic_0001>
module attributes {stable_mosaic.version = 11 : i64} {
  func.func @_add_pe_kernel(%arg0: i32, %arg1: i32, %arg2: memref<2x2x128xf32, #tpu.memory_space<vmem>>, %arg3: memref<1x2x128xf32, #tpu.memory_space<vmem>>, %arg4: memref<2x2x128xf32, #tpu.memory_space<vmem>>) attributes {dimension_semantics = [#tpu.dimension_semantics<parallel>, #tpu.dimension_semantics<parallel>], iteration_bounds = array<i64: 1, 1>, scalar_prefetch = 0 : i64, scratch_operands = 0 : i64, tpu.core_type = #tpu.core_type<tc>, window_params = [{transform_indices = @transform_0, window_bounds = array<i64: 2, 2, 128>}, {transform_indices = @transform_1, window_bounds = array<i64: 1, 2, 128>}, {transform_indices = @transform_2, window_bounds = array<i64: 2, 2, 128>}]} {
    %c0 = arith.constant 0 : index
    %c0_0 = arith.constant 0 : index
    %c0_1 = arith.constant 0 : index
    %0 = vector.load %arg2[%c0, %c0_0, %c0_1] : memref<2x2x128xf32, #tpu.memory_space<vmem>>, vector<2x2x128xf32>
    %c0_2 = arith.constant 0 : index
    %c0_3 = arith.constant 0 : index
    %c0_4 = arith.constant 0 : index
    %1 = vector.load %arg3[%c0_2, %c0_3, %c0_4] : memref<1x2x128xf32, #tpu.memory_space<vmem>>, vector<1x2x128xf32>
    %2 = vector.broadcast %1 : vector<1x2x128xf32> to vector<2x2x128xf32>
    %3 = arith.addf %0, %2 : vector<2x2x128xf32>
    %c0_5 = arith.constant 0 : index
    %c0_6 = arith.constant 0 : index
    %c0_7 = arith.constant 0 : index
    %4 = vector.load %arg4[%c0_5, %c0_6, %c0_7] : memref<2x2x128xf32, #tpu.memory_space<vmem>>, vector<2x2x128xf32>
    tpu.vector_store %arg4[%c0_5, %c0_6, %c0_7], %3 {strides = array<i32>} : memref<2x2x128xf32, #tpu.memory_space<vmem>>, vector<2x2x128xf32>,
    return
  }
  func.func @transform_0(%arg0: i32, %arg1: i32) -> (i32, i32, i32) {
    %c0_i32 = arith.constant 0 : i32
    %c0_i32_0 = arith.constant 0 : i32
    return %arg1, %arg0, %c0_i32 : i32, i32, i32
  }
  func.func @transform_1(%arg0: i32, %arg1: i32) -> (i32, i32, i32) {
    %c0_i32 = arith.constant 0 : i32
    %c0_i32_0 = arith.constant 0 : i32
    %c0_i32_1 = arith.constant 0 : i32
    return %c0_i32, %arg0, %c0_i32_0 : i32, i32, i32
  }
  func.func @transform_2(%arg0: i32, %arg1: i32) -> (i32, i32, i32) {
    %c0_i32 = arith.constant 0 : i32
    %c0_i32_0 = arith.constant 0 : i32
    return %arg1, %arg0, %c0_i32 : i32, i32, i32
  }
}

</mosaic_0001>

<bundles_post_ra>
// kernel: tpu_custom_call.1
= control target key start
LH: loop header
LB: loop body
LE: loop exit
PB: predicated region body
PF: predicated region fallthrough
CT: control target
= control target key end

     0   :  { %7 = vsyncpa [#allocation3], 0  ;;  %s181_s0 = inlined_call_operand.hbm [shape: f32[2,2,128], index: 0, kind: input, shape index: {}]   ;;  %s182_s1 = inlined_call_operand.hbm [shape: f32[1,2,128], index: 1, kind: input, shape index: {}]   ;;  %s183_s2 = inlined_call_operand.hbm [shape: f32[2,2,128], index: 2, kind: output, shape index: {}]  }
   0x1   :  { %8 = vsyncpa [#allocation6], 0 }
   0x2   :  { %9 = vsyncpa [#allocation4], 0  ;;  %s14_s11 = sshll.u32 %s181_s0, 4  ;;  %s152_s12 = smov [#allocation2]   ;;  %s15_s11 = int_to_ptr.hbm [resolvable:$true] %s14_s11 }
   0x3   :  { %s16_s13 = sshll.u32 %s152_s12, 4  ;;  %s28_s16 = sshll.u32 %s182_s1, 4  ;;  %s17_s13 = int_to_ptr.vmem [resolvable:$true] %s16_s13  ;;  %s29_s16 = int_to_ptr.hbm [resolvable:$true] %s28_s16 }
   0x4   :  { %s153_s17 = smov 32   ;;  %s154_s18 = smov 2  }
   0x5   :  { %22 = dma.hbm_to_vmem [thread:$0]  %s15_s11, 64, %s17_s13, [#allocation3], %s153_s17, %s153_s17, %s154_s18  }
   0x6   :  { %s155_s19 = smov [#allocation5]  }
   0x7   :  { %s30_s20 = sshll.u32 %s155_s19, 4  ;;  %s31_s20 = int_to_ptr.vmem [resolvable:$true] %s30_s20 }
   0x8   :  { %33 = dma.hbm_to_vmem [thread:$0]  %s29_s16, 32, %s31_s20, [#allocation6]  }
   0x9   :  { %146 = dma.done.wait [#allocation3], 64  }
   0xa   :  { %147 = vsyncadd [#allocation3], 4294967232 }
   0xb   :  { %148 = dma.done.wait [#allocation6], 32  }
   0xc   :  { %149 = vsyncadd [#allocation6], 4294967264  ;;  %s156_s0 = smov [#allocation7]   ;;  %s55_s24 = sshll.u32 %s183_s2, 4  ;;  %v42_v0 = vld [vmem:[#allocation2] sm:$0x3]  ;;  %s56_s24 = int_to_ptr.hbm [resolvable:$true] %s55_s24 }
   0xd   :  { %s53_s21 = sshll.u32 %s156_s0, 4  ;;  %v44_v1 = vld [vmem:[#allocation5] sm:$0x3]  ;;  %v43_v2 = vld [vmem:[#allocation2 + $0x2] sm:$0x3]  ;;  %s54_s21 = int_to_ptr.vmem [resolvable:$true] %s53_s21 }
   0xe   :  { %v45_v3 = vadd.f32 %v44_v1, %v42_v0  ;;  %v46_v4 = vadd.f32 %v44_v1, %v43_v2 }
  0x10   :  { %47 = vst [vmem:[#allocation7] sm:$0x3] %v45_v3 }
  0x11   :  { %48 = vst [vmem:[#allocation7 + $0x2] sm:$0x3] %v46_v4 }
  0x12   :  { %61 = dma.vmem_to_hbm [thread:$0]  %s54_s21, 64, %s56_s24, [#allocation4], %s153_s17, %s153_s17, %s154_s18  }
  0x13   :  { %150 = dma.done.wait [#allocation4], 64  }
  0x14   :  { %151 = vsyncadd [#allocation4], 4294967232 }
  0x15   :  { %66 = vsyncpa [#allocation3], 1 }
  0x16   :  { %67 = vsyncpa [#allocation6], 1 }
  0x17   :  { %68 = vsyncpa [#allocation4], 1 }

</bundles_post_ra>
